<compile_context>
chip_gen: v7x
topology: tpu7x:2x2x1
jax: 0.10.0
libtpu: 0.0.40
codegen_flags: <defaults>
</compile_context>

<pallas_src>
import functools
import math

import jax
import jax.numpy as jnp
from jax.experimental import pallas as pl
from jax.experimental.pallas import tpu as pltpu


_LANE = 128
_SUBLANE = 8
_BLOCK_BUDGET = 4 << 20           # ~4 MiB per streamed f32 block; with input+
                                  # output double-buffered this stays well under
_VMEM_LIMIT = 32 * 1024 * 1024    # the explicit 32 MiB scoped-VMEM limit
                                  # (safe on v5e/v6e/v7x).


# ---------------------------------------------------------------------------
# Tiling helpers (hardened fallbacks; see TODOs for pathological shapes).
# ---------------------------------------------------------------------------
def _pick_lane_tile(n, rows, target_bytes=_BLOCK_BUDGET):
    """Lane (last-dim) tile for an f32 (rows, n) array: the full axis if the
    block is already small, else the largest 128-aligned divisor of n such
    that one (rows, tile) block is ~target_bytes."""
    if n * rows * 4 <= 2 * target_bytes:
        return n
    cap = max(_LANE, (target_bytes // (rows * 4)) // _LANE * _LANE)
    t = min(cap, (n // _LANE) * _LANE)
    while t >= _LANE:
        if n % t == 0:
            return t
        t -= _LANE
    # TODO(synk): n has no 128-aligned divisor; the full-axis fallback block can
    # exceed the per-block budget for very large, oddly-sized C*H*W.
    return n


def _pick_row_tile(n_rows, row_bytes, budget_bytes=_BLOCK_BUDGET):
    """Row (second-minor) tile: full R if it fits, else the largest 8-aligned
    divisor of R whose f32 block fits budget_bytes (minimum 8 rows)."""
    if n_rows * row_bytes <= budget_bytes:
        return n_rows
    if n_rows % _SUBLANE != 0:
        # TODO(synk): B*C not 8-aligned; fall back to one full-R block.
        return n_rows
    best = _SUBLANE
    r = _SUBLANE
    while r <= n_rows and r * row_bytes <= budget_bytes:
        if n_rows % r == 0:
            best = r
        r += _SUBLANE
    return best


# ---------------------------------------------------------------------------
# Pass 1: per-sample min / max (QuantMeasure statistics).
# Grid = (parallel partials, serial reduction); the (1, B, 1) output block
# stays resident across the serial axis (accumulator pattern).
# ---------------------------------------------------------------------------
def _quant_minmax_kernel(x_ref, mn_ref, mx_ref):
    @pl.when(pl.program_id(1) == 0)
    def _init():
        mn_ref[...] = jnp.full(mn_ref.shape, jnp.inf, dtype=mn_ref.dtype)
        mx_ref[...] = jnp.full(mx_ref.shape, -jnp.inf, dtype=mx_ref.dtype)

    x = x_ref[...]                                             # (B, TN)
    mn_ref[...] = jnp.minimum(mn_ref[...],
                              jnp.min(x, axis=-1, keepdims=True)[None])
    mx_ref[...] = jnp.maximum(mx_ref[...],
                              jnp.max(x, axis=-1, keepdims=True)[None])


# ---------------------------------------------------------------------------
# Pass 2: per-(batch, channel) row stats of the 8-bit code r(x), lane-dense.
#   stats[:, 0] = sum over chunks of max(r)
#   stats[:, 1] = sum over chunks of min(r)
#   stats[:, 2] = sum over the whole row of r   (computed on the MXU)
# Chunk max/min are taken on raw x (the code mapping is monotone increasing),
# and the mapping is applied to the already-reduced (TR, cpr) values only.
# ---------------------------------------------------------------------------
def _bn_stats_kernel(qp_ref, x_ref, stats_ref, *, cpr, seg_len):
    zp = qp_ref[0]                 # SMEM scalars: zero_point, 1/scale
    inv_scale = qp_ref[1]

    x = x_ref[...]                                             # (TR, S)
    r = jnp.round(jnp.clip((x - zp) * inv_scale, 0.0, 255.0))  # 8-bit codes

    # Row sum of codes on the MXU; keeps the XLU free for the max/min passes.
    ones = jnp.ones((r.shape[1], 1), dtype=jnp.float32)
    rsum = jnp.dot(r, ones, preferred_element_type=jnp.float32)    # (TR, 1)

    cmax, cmin = [], []
    for ci in range(cpr):                      # statically unrolled, cpr small
        seg = x_ref[:, ci * seg_len:(ci + 1) * seg_len]            # (TR, L)
        cmax.append(jnp.max(seg, axis=-1, keepdims=True))
        cmin.append(jnp.min(seg, axis=-1, keepdims=True))
    cmax = jnp.concatenate(cmax, axis=-1)                          # (TR, cpr)
    cmin = jnp.concatenate(cmin, axis=-1)
    rmax = jnp.round(jnp.clip((cmax - zp) * inv_scale, 0.0, 255.0))
    rmin = jnp.round(jnp.clip((cmin - zp) * inv_scale, 0.0, 255.0))

    stats_ref[...] = jnp.concatenate(
        [jnp.sum(rmax, axis=-1, keepdims=True),
         jnp.sum(rmin, axis=-1, keepdims=True),
         rsum], axis=-1)                                           # (TR, 3)


# ---------------------------------------------------------------------------
# Pass 3: fused fake-quant + normalize + affine, lane-dense rows.
#   out = r(x) * a2_row + c2_row
# with the dequant affine folded into the per-row constants.
# ---------------------------------------------------------------------------
def _bn_apply_kernel(qp_ref, x_ref, a_ref, c_ref, out_ref):
    zp = qp_ref[0]
    inv_scale = qp_ref[1]
    x = x_ref[...]                                                 # (TR, TS)
    r = jnp.round(jnp.clip((x - zp) * inv_scale, 0.0, 255.0))
    out_ref[...] = r * a_ref[...] + c_ref[...]                     # (TR,1) bcast


# ---------------------------------------------------------------------------
# Public wrapper: training-mode RangeBN forward on NCHW float32 input.
# ---------------------------------------------------------------------------
def range_bn_forward(x, weight, bias, running_mean, running_var, *,
                     num_chunks=16, eps=1e-5, momentum=0.1):
    """Returns (out, new_running_mean, new_running_var), matching RangeBN."""
    B, C, H, W = x.shape
    S = H * W
    R = B * C
    N = C * S
    x = x.astype(jnp.float32)
    weight = weight.astype(jnp.float32)
    bias = bias.astype(jnp.float32)

    assert (B * S) % num_chunks == 0, "num_chunks must divide B*H*W"
    # TODO(synk): chunk layouts where a chunk straddles a batch element
    # (num_chunks % B != 0) would need a gather/transpose stats pass.
    assert num_chunks % B == 0 and S % (num_chunks // B) == 0, (
        "transpose-free path requires chunks aligned to batch elements")
    cpr = num_chunks // B
    L = S // cpr                                   # == B*H*W // num_chunks

    smem_spec = pl.BlockSpec(memory_space=pltpu.MemorySpace.SMEM)

    # ---- Pass 1: per-sample min/max ----------------------------------------
    x2d = x.reshape(B, N)                          # free reshape of NCHW
    tn = _pick_lane_tile(N, B)
    n_tiles = N // tn
    p_par = 1
    for cand in (8, 4, 2):                         # parallel partials (v7x megacore)
        if n_tiles % cand == 0:
            p_par = cand
            break
    n_serial = n_tiles // p_par
    mn, mx = pl.pallas_call(
        _quant_minmax_kernel,
        out_shape=(jax.ShapeDtypeStruct((p_par, B, 1), jnp.float32),
                   jax.ShapeDtypeStruct((p_par, B, 1), jnp.float32)),
        grid=(p_par, n_serial),
        in_specs=[pl.BlockSpec((B, tn), lambda p, j: (0, p * n_serial + j))],
        out_specs=(pl.BlockSpec((1, B, 1), lambda p, j: (p, 0, 0)),
                   pl.BlockSpec((1, B, 1), lambda p, j: (p, 0, 0))),
        compiler_params=pltpu.CompilerParams(
            dimension_semantics=("parallel", "arbitrary"),
            vmem_limit_bytes=_VMEM_LIMIT),
        cost_estimate=pl.CostEstimate(
            flops=2 * B * N, transcendentals=0,
            bytes_accessed=4 * B * N + 8 * B * p_par),
    )(x2d)

    # Tiny scalar math: QuantMeasure qparams (num_bits=8, unsigned).
    per_min = jnp.min(mn, axis=0)[:, 0]            # (B,)
    per_max = jnp.max(mx, axis=0)[:, 0]
    zp = jnp.minimum(jnp.mean(per_min), 0.0)       # min_values[min>0] = 0
    mxv = jnp.maximum(jnp.mean(per_max), 0.0)      # max_values[max<0] = 0
    rng = mxv - zp
    rng = jnp.where(rng == 0.0, 1.0, rng)          # range_values[range==0] = 1
    rng = jnp.clip(rng, 1e-6, 1e5)                 # running_range.clamp
    qscale = rng / 255.0
    inv_qscale = 255.0 / rng
    qparams = jnp.stack([zp, inv_qscale]).astype(jnp.float32)   # SMEM (2,)

    # ---- Pass 2: per-(b,c) row code statistics ------------------------------
    x_rows = x.reshape(R, S)                       # free reshape (no transpose)
    tr = _pick_row_tile(R, S * 4)
    grid_rows = R // tr
    # TODO(synk): pass 2 needs the full row even at tr=8; extremely large H*W
    # would need an S-tiled two-level chunk reduction.
    stats = pl.pallas_call(
        functools.partial(_bn_stats_kernel, cpr=cpr, seg_len=L),
        out_shape=jax.ShapeDtypeStruct((R, 3), jnp.float32),
        grid=(grid_rows,),
        in_specs=[smem_spec, pl.BlockSpec((tr, S), lambda i: (i, 0))],
        out_specs=pl.BlockSpec((tr, 3), lambda i: (i, 0)),
        compiler_params=pltpu.CompilerParams(
            dimension_semantics=("parallel",),
            vmem_limit_bytes=_VMEM_LIMIT),
        cost_estimate=pl.CostEstimate(
            flops=8 * R * S, transcendentals=0,
            bytes_accessed=4 * R * S + 12 * R + 8),
    )(qparams, x_rows)

    # ---- Per-channel constants (C-sized JAX glue), all in code domain -------
    stats_bc = stats.reshape(B, C, 3)              # row r = b*C + c
    mean_max_r = jnp.sum(stats_bc[..., 0], axis=0) / num_chunks
    mean_min_r = jnp.sum(stats_bc[..., 1], axis=0) / num_chunks
    mean_r = jnp.sum(stats_bc[..., 2], axis=0) / (B * S)
    scale_fix = (0.5 * 0.35 * (1 + (math.pi * math.log(4)) ** 0.5)
                 / (2 * math.log(L)) ** 0.5)
    bn_scale = (mean_max_r - mean_min_r) * qscale * scale_fix     # q-domain
    mean_q = mean_r * qscale + zp                                 # q-domain
    a_ch = weight / (bn_scale + eps)
    a2 = a_ch * qscale                     # out = r * a2 + c2  (affine folded)
    c2 = bias - a2 * mean_r
    a_rows = jnp.tile(a2, B).reshape(R, 1)
    c_rows = jnp.tile(c2, B).reshape(R, 1)

    # ---- Pass 3: fused quantize + normalize + affine ------------------------
    if tr * S * 4 > _BLOCK_BUDGET:
        ts = _pick_lane_tile(S, tr, target_bytes=_BLOCK_BUDGET // 2)
    else:
        ts = S
    grid_s = S // ts
    out2d = pl.pallas_call(
        _bn_apply_kernel,
        out_shape=jax.ShapeDtypeStruct((R, S), jnp.float32),
        grid=(grid_rows, grid_s),
        in_specs=[smem_spec,
                  pl.BlockSpec((tr, ts), lambda i, j: (i, j)),
                  pl.BlockSpec((tr, 1), lambda i, j: (i, 0)),
                  pl.BlockSpec((tr, 1), lambda i, j: (i, 0))],
        out_specs=pl.BlockSpec((tr, ts), lambda i, j: (i, j)),
        compiler_params=pltpu.CompilerParams(
            dimension_semantics=("parallel", "parallel"),
            vmem_limit_bytes=_VMEM_LIMIT),
        cost_estimate=pl.CostEstimate(
            flops=6 * R * S, transcendentals=0,
            bytes_accessed=8 * R * S + 8 * R + 8),
    )(qparams, x_rows, a_rows, c_rows)
    out = out2d.reshape(B, C, H, W)

    # Buffer updates are in-place side effects in PyTorch; returned here
    # (RangeBN convention: running * momentum + stat * (1 - momentum)).
    new_running_mean = running_mean * momentum + mean_q * (1.0 - momentum)
    new_running_var = running_var * momentum + bn_scale * (1.0 - momentum)

    # quantize_grad(out, ...) is identity in the forward pass; the H == W == 1
    # squeeze branch is not taken for spatial inputs.
    # TODO(synk): single fused small-tensor fast path (x resident in VMEM,
    # 1 read + 1 write) intentionally left out to keep the lowering portable.
    return out, new_running_mean, new_running_var


# ---------------------------------------------------------------------------
# Pure-JAX reference (mirrors the PyTorch forward) for a correctness check.
# ---------------------------------------------------------------------------
def _ref_forward(x, weight, bias, *, num_chunks=16, eps=1e-5):
    B, C, H, W = x.shape
    xf = x.reshape(B, -1)
    zp = jnp.minimum(jnp.mean(jnp.min(xf, axis=-1)), 0.0)
    mxm = jnp.maximum(jnp.mean(jnp.max(xf, axis=-1)), 0.0)
    rng = mxm - zp
    rng = jnp.where(rng == 0.0, 1.0, rng)
    rng = jnp.clip(rng, 1e-6, 1e5)
    scale = rng / 255.0
    inv_scale = 255.0 / rng
    q = jnp.round(jnp.clip((x - zp) * inv_scale, 0.0, 255.0)) * scale + zp
    y = jnp.transpose(q, (1, 0, 2, 3)).reshape(C, num_chunks, -1)
    L = y.shape[-1]
    mean_max = jnp.mean(jnp.max(y, axis=-1), axis=-1)
    mean_min = jnp.mean(jnp.min(y, axis=-1), axis=-1)
    mean = jnp.mean(y.reshape(C, -1), axis=-1)
    scale_fix = (0.5 * 0.35 * (1 + (math.pi * math.log(4)) ** 0.5)
                 / (2 * math.log(L)) ** 0.5)
    s = (mean_max - mean_min) * scale_fix
    out = (q - mean[None, :, None, None]) / (s[None, :, None, None] + eps)
    out = out * weight[None, :, None, None] + bias[None, :, None, None]
    return out, mean, s


if __name__ == "__main__":
    key = jax.random.PRNGKey(0)
    kx, kw = jax.random.split(key)

    B, C, H, W = 2, 4, 16, 16
    num_features = C

    x = jax.random.normal(kx, (B, C, H, W), dtype=jnp.float32)
    # reset_params(): weight ~ U[0,1), bias = 0  (deterministic via PRNGKey)
    weight = jax.random.uniform(kw, (num_features,), dtype=jnp.float32)
    bias = jnp.zeros((num_features,), dtype=jnp.float32)
    running_mean = jnp.zeros((num_features,), dtype=jnp.float32)
    running_var = jnp.zeros((num_features,), dtype=jnp.float32)

    out, new_rm, new_rv = range_bn_forward(
        x, weight, bias, running_mean, running_var,
        num_chunks=16, eps=1e-5, momentum=0.1)
    jax.block_until_ready(out)
    jax.block_until_ready(new_rm)
    jax.block_until_ready(new_rv)

    ref_out, ref_mean, ref_scale = _ref_forward(
        x, weight, bias, num_chunks=16, eps=1e-5)
    assert out.shape == (B, C, H, W)
    assert jnp.allclose(out, ref_out, rtol=1e-5, atol=5e-5), "output mismatch"
    assert jnp.allclose(new_rm, ref_mean * 0.9, rtol=1e-4, atol=5e-5), "mean mismatch"
    assert jnp.allclose(new_rv, ref_scale * 0.9, rtol=1e-4, atol=1e-5), "scale mismatch"

    print("KERNEL_OK")
</pallas_src>

<mosaic_0001>
module attributes {stable_mosaic.version = 11 : i64} {
  func.func @_quant_minmax_kernel(%arg0: i32, %arg1: i32, %arg2: memref<2x1024xf32, #tpu.memory_space<vmem>>, %arg3: memref<1x2x1xf32, #tpu.memory_space<vmem>>, %arg4: memref<1x2x1xf32, #tpu.memory_space<vmem>>) attributes {dimension_semantics = [#tpu.dimension_semantics<parallel>, #tpu.dimension_semantics<arbitrary>], iteration_bounds = array<i64: 1, 1>, scalar_prefetch = 0 : i64, scratch_operands = 0 : i64, tpu.core_type = #tpu.core_type<tc>, window_params = [{transform_indices = @transform_0, window_bounds = array<i64: 2, 1024>}, {transform_indices = @transform_1, window_bounds = array<i64: 1, 2, 1>}, {transform_indices = @transform_2, window_bounds = array<i64: 1, 2, 1>}]} {
    %c0_i32 = arith.constant 0 : i32
    %0 = arith.cmpi eq, %arg1, %c0_i32 : i32
    %1 = arith.extui %0 : i1 to i32
    %c0_i32_0 = arith.constant 0 : i32
    %2 = arith.cmpi ne, %1, %c0_i32_0 : i32
    scf.if %2 {
      %cst_15 = arith.constant 0x7F800000 : f32
      %16 = vector.broadcast %cst_15 : f32 to vector<1x2x1xf32>
      %c0_16 = arith.constant 0 : index
      %c0_17 = arith.constant 0 : index
      %c0_18 = arith.constant 0 : index
      %17 = vector.load %arg3[%c0_16, %c0_17, %c0_18] : memref<1x2x1xf32, #tpu.memory_space<vmem>>, vector<1x2x1xf32>
      tpu.vector_store %arg3[%c0_16, %c0_17, %c0_18], %16 {strides = array<i32>} : memref<1x2x1xf32, #tpu.memory_space<vmem>>, vector<1x2x1xf32>,
      %cst_19 = arith.constant 0xFF800000 : f32
      %18 = vector.broadcast %cst_19 : f32 to vector<1x2x1xf32>
      %c0_20 = arith.constant 0 : index
      %c0_21 = arith.constant 0 : index
      %c0_22 = arith.constant 0 : index
      %19 = vector.load %arg4[%c0_20, %c0_21, %c0_22] : memref<1x2x1xf32, #tpu.memory_space<vmem>>, vector<1x2x1xf32>
      tpu.vector_store %arg4[%c0_20, %c0_21, %c0_22], %18 {strides = array<i32>} : memref<1x2x1xf32, #tpu.memory_space<vmem>>, vector<1x2x1xf32>,
    } else {
    }
    %c0 = arith.constant 0 : index
    %c0_1 = arith.constant 0 : index
    %3 = vector.load %arg2[%c0, %c0_1] : memref<2x1024xf32, #tpu.memory_space<vmem>>, vector<2x1024xf32>
    %c0_2 = arith.constant 0 : index
    %c0_3 = arith.constant 0 : index
    %c0_4 = arith.constant 0 : index
    %4 = vector.load %arg3[%c0_2, %c0_3, %c0_4] : memref<1x2x1xf32, #tpu.memory_space<vmem>>, vector<1x2x1xf32>
    %cst = arith.constant dense<0x7F800000> : vector<2xf32>
    %5 = vector.multi_reduction <minimumf>, %3, %cst [1] : vector<2x1024xf32> to vector<2xf32>
    %6 = vector.shape_cast %5 : vector<2xf32> to vector<2x1xf32>
    %7 = vector.shape_cast %6 : vector<2x1xf32> to vector<1x2x1xf32>
    %8 = arith.minimumf %4, %7 : vector<1x2x1xf32>
    %c0_5 = arith.constant 0 : index
    %c0_6 = arith.constant 0 : index
    %c0_7 = arith.constant 0 : index
    %9 = vector.load %arg3[%c0_5, %c0_6, %c0_7] : memref<1x2x1xf32, #tpu.memory_space<vmem>>, vector<1x2x1xf32>
    tpu.vector_store %arg3[%c0_5, %c0_6, %c0_7], %8 {strides = array<i32>} : memref<1x2x1xf32, #tpu.memory_space<vmem>>, vector<1x2x1xf32>,
    %c0_8 = arith.constant 0 : index
    %c0_9 = arith.constant 0 : index
    %c0_10 = arith.constant 0 : index
    %10 = vector.load %arg4[%c0_8, %c0_9, %c0_10] : memref<1x2x1xf32, #tpu.memory_space<vmem>>, vector<1x2x1xf32>
    %cst_11 = arith.constant dense<0xFF800000> : vector<2xf32>
    %11 = vector.multi_reduction <maximumf>, %3, %cst_11 [1] : vector<2x1024xf32> to vector<2xf32>
    %12 = vector.shape_cast %11 : vector<2xf32> to vector<2x1xf32>
    %13 = vector.shape_cast %12 : vector<2x1xf32> to vector<1x2x1xf32>
    %14 = arith.maximumf %10, %13 : vector<1x2x1xf32>
    %c0_12 = arith.constant 0 : index
    %c0_13 = arith.constant 0 : index
    %c0_14 = arith.constant 0 : index
    %15 = vector.load %arg4[%c0_12, %c0_13, %c0_14] : memref<1x2x1xf32, #tpu.memory_space<vmem>>, vector<1x2x1xf32>
    tpu.vector_store %arg4[%c0_12, %c0_13, %c0_14], %14 {strides = array<i32>} : memref<1x2x1xf32, #tpu.memory_space<vmem>>, vector<1x2x1xf32>,
    return
  }
  func.func @transform_0(%arg0: i32, %arg1: i32) -> (i32, i32) {
    %c1_i32 = arith.constant 1 : i32
    %0 = arith.muli %arg0, %c1_i32 : i32
    %1 = arith.addi %0, %arg1 : i32
    %c0_i32 = arith.constant 0 : i32
    %c0_i32_0 = arith.constant 0 : i32
    return %c0_i32, %1 : i32, i32
  }
  func.func @transform_1(%arg0: i32, %arg1: i32) -> (i32, i32, i32) {
    %c0_i32 = arith.constant 0 : i32
    %c0_i32_0 = arith.constant 0 : i32
    %c0_i32_1 = arith.constant 0 : i32
    return %arg0, %c0_i32, %c0_i32_0 : i32, i32, i32
  }
  func.func @transform_2(%arg0: i32, %arg1: i32) -> (i32, i32, i32) {
    %c0_i32 = arith.constant 0 : i32
    %c0_i32_0 = arith.constant 0 : i32
    %c0_i32_1 = arith.constant 0 : i32
    return %arg0, %c0_i32, %c0_i32_0 : i32, i32, i32
  }
}

</mosaic_0001>

<bundles_post_ra>
// kernel: tpu_custom_call.1
= control target key start
LH: loop header
LB: loop body
LE: loop exit
PB: predicated region body
PF: predicated region fallthrough
CT: control target
= control target key end

     0   :  { %8 = vsyncpa [#allocation3], 0  ;;  %s162_s9 = smov [#allocation2]   ;;  %s231_s0 = inlined_call_operand.hbm [shape: f32[2,1024], index: 0, kind: input, shape index: {}]   ;;  %s232_s1 = inlined_call_operand.vmem [shape: f32[1,2,1], index: 1, kind: output, shape index: {0}]   ;;  %s233_s2 = inlined_call_operand.vmem [shape: f32[1,2,1], index: 2, kind: output, shape index: {1}]  }
   0x1   :  { %s19_s10 = sshll.u32 %s162_s9, 4  ;;  %s138_s13 = scalar_lea.hbm %s231_s0, 256  ;;  %s20_s10 = int_to_ptr.vmem [resolvable:$true] %s19_s10 }
   0x2   :  { %p139_p0 = scmp.ne.s32.totalorder %s231_s0, %s138_s13  ;;  %p142_p1 = scmp.lt.u32.totalorder %s138_s13, %s231_s0 }
   0x4   :  { %p144_p2 = pnand %p142_p1, %p139_p0 }
   0x6   :  { %147 = shalt.err (!%p144_p2)
}
   0x7   :  { %s148_s18 = scalar_lea.vmem %s20_s10, 256  ;;  %p153_p4 = scmp.lt.s32.totalorder %s20_s10, %s20_s10 }
   0x8   :  { %p149_p3 = scmp.ne.s32.totalorder %s20_s10, %s148_s18  ;;  %p154_p5 = scmp.lt.s32.totalorder %s148_s18, %s148_s18 }
   0xa   :  { %p155_p6 = por %p154_p5, %p153_p4 }
   0xc   :  { %p156_p7 = pnand %p155_p6, %p149_p3 }
   0xe   :  { %159 = shalt.err (!%p156_p7)
}
   0xf   :  { %22 = dma.hbm_to_vmem [thread:$0]  %s231_s0, 256, %s20_s10, [#allocation3]  }
  0x10   :  { %160 = dma.done.wait [#allocation3], 256  }
  0x11   :  { %161 = vsyncadd [#allocation3], 4294967040  ;;  %v44_v0 = vlaneseq  ;;  %vm32_vm0 = vcmask 1024   ;;  %v163_v1 = vmov 1983009808   ;;  %v164_v4 = vmov inf  }
  0x12   :  { %v42_v2 = vunpack.c.l.s4 %v163_v1  ;;  %33 = vst.msk [vmem:[%s232_s1] sm:$0x3] %vm32_vm0, %v164_v4  ;;  %v35_v7 = vld [vmem:[#allocation2] sm:$0xff]  ;;  %v36_v8 = vld [vmem:[#allocation2 + $0x8] sm:$0xff]  ;;  %vm82_vm1 = vcmask 1041408   ;;  %v165_v49 = vmov -inf  }
  0x13   :  { %v45_v3 = vshrl.u32 %v44_v0, 7  ;;  %v40_v9 = vcombine.high %v35_v7, %v35_v7  ;;  %v57_v11 = vcombine.high %v36_v8, %v36_v8  ;;  %34 = vst.msk [vmem:[%s233_s2] sm:$0x3] %vm32_vm0, %v165_v49 }
  0x14   :  { %v43_v5 = vunpack.c.0.s8 %v42_v2 }
  0x16   :  { %v46_v6 = vsub.s32 %v43_v5, %v45_v3 }
  0x18   :  { %v47_v10 = vrot.slane %v35_v7, %v46_v6  ;;  %v64_v12 = vrot.slane %v36_v8, %v46_v6  ;;  %v54_v13 = vrot.slane %v40_v9, %v46_v6  ;;  %v71_v15 = vrot.slane %v57_v11, %v46_v6 }
  0x19   :  { %v37_v50 = vld [vmem:[%s232_s1] sm:$0x3] }
  0x1a   :  { %v55_v14 = vcombine.high %v47_v10, %v47_v10  ;;  %v72_v16 = vcombine.high %v64_v12, %v64_v12  ;;  %v83_v17 = vsel %vm82_vm1, %v47_v10, inf  ;;  %v87_v18 = vsel %vm82_vm1, %v64_v12, inf  ;;  %v103_v53 = vld [vmem:[%s233_s2] sm:$0x3] }
  0x1b   :  { %v104_v19 = vsel %vm82_vm1, %v47_v10, -inf  ;;  %v108_v20 = vsel %vm82_vm1, %v64_v12, -inf  ;;  %v56_v21 = vcombine.high %v54_v13, %v54_v13  ;;  %v73_v22 = vcombine.high %v71_v15, %v71_v15 }
  0x1c   :  { %v84_v23 = vsel %vm82_vm1, %v55_v14, inf  ;;  %v85_v24 = vsel %vm82_vm1, %v54_v13, inf  ;;  %v88_v25 = vmin.f32 %v83_v17, %v87_v18  ;;  %v89_v26 = vsel %vm82_vm1, %v72_v16, inf }
  0x1d   :  { %v91_v27 = vsel %vm82_vm1, %v71_v15, inf  ;;  %v105_v28 = vsel %vm82_vm1, %v55_v14, -inf  ;;  %v86_v29 = vsel %vm82_vm1, %v56_v21, inf  ;;  %v90_v30 = vmin.f32 %v84_v23, %v89_v26 }
  0x1e   :  { %v92_v31 = vmin.f32 %v85_v24, %v91_v27  ;;  %v93_v32 = vsel %vm82_vm1, %v73_v22, inf  ;;  %v106_v34 = vsel %vm82_vm1, %v54_v13, -inf  ;;  %v107_v35 = vsel %vm82_vm1, %v56_v21, -inf }
  0x1f   :  { %v94_v33 = vmin.f32 %v86_v29, %v93_v32  ;;  %v109_v36 = vmax.f32 %v104_v19, %v108_v20  ;;  %v95_v37 = vmin.f32 %v88_v25, %v90_v30  ;;  %v110_v38 = vsel %vm82_vm1, %v72_v16, -inf }
  0x20   :  { %v112_v39 = vsel %vm82_vm1, %v71_v15, -inf  ;;  %v114_v40 = vsel %vm82_vm1, %v73_v22, -inf  ;;  %v111_v42 = vmax.f32 %v105_v28, %v110_v38 }
  0x21   :  { %v96_v41 = vmin.f32 %v92_v31, %v94_v33  ;;  %v113_v43 = vmax.f32 %v106_v34, %v112_v39  ;;  %v115_v44 = vmax.f32 %v107_v35, %v114_v40 }
  0x22   :  { %v116_v46 = vmax.f32 %v109_v36, %v111_v42 }
  0x23   :  { %v97_v45 = vmin.f32 %v95_v37, %v96_v41  ;;  %v117_v47 = vmax.f32 %v113_v43, %v115_v44 }
  0x25   :  { %98 = vmin.xlane.f32.xlu0 %v97_v45  ;;  %v118_v48 = vmax.f32 %v116_v46, %v117_v47 }
  0x29   :  { %119 = vmax.xlane.f32.xlu0 %v118_v48 }
  0xb2   :  { %v99_v51 = vpop.xlane.xlu0 %98 }
  0xb3   :  { %v100_v52 = vmin.f32 %v37_v50, %v99_v51 }
  0xb5   :  { %102 = vst.msk [vmem:[%s232_s1] sm:$0x3] %vm32_vm0, %v100_v52 }
  0xb6   :  { %v120_v54 = vpop.xlane.xlu0 %119 }
  0xb7   :  { %v121_v55 = vmax.f32 %v103_v53, %v120_v54 }
  0xb9   :  { %122 = vst.msk [vmem:[%s233_s2] sm:$0x3] %vm32_vm0, %v121_v55 }
  0xba   :  { %131 = vsyncpa [#allocation3], 1 }

</bundles_post_ra>
